<compile_context>
chip_gen: v7x
topology: tpu7x:2x2x1
jax: 0.10.0
libtpu: 0.0.40
codegen_flags: <defaults>
</compile_context>

<pallas_src>
import jax
import jax.numpy as jnp
from jax.experimental import pallas as pl
from jax.experimental.pallas import tpu as pltpu

EPS = 1e-5


def add_attn_kernel(zin_ref, wcat_ref, prm_ref, o_ref):
    # zin : (2Cx+Cg, N)  = [x_even ; x_odd ; g_up], channel-major, (b,l) on lanes
    # wcat: (3Cx, 2Cx+Cg) fused weight block (see header)
    # prm : (Cx, 6)      = [bphi, wpsi, bw, gamma, beta, bpsi(replicated)]
    # o   : (Cx, 2N)     = [normalized even phase | normalized odd phase]
    cx = prm_ref.shape[0]
    n = zin_ref.shape[1]

    zin = zin_ref[...]
    prm = prm_ref[...]
    bphi = prm[:, 0:1]
    wpsi = prm[:, 1:2]
    bw = prm[:, 2:3]
    gamma = prm[:, 3:4]
    beta = prm[:, 4:5]
    bpsi = prm[0:1, 5:6]

    # one MXU pass: rows = [theta(x)+phi(g_up) preact ; Ww@x_even ; Ww@x_odd]
    z = jnp.dot(wcat_ref[...], zin, preferred_element_type=jnp.float32)  # (3Cx, N)
    tp = z[:cx, :] + bphi
    wx_e = z[cx:2 * cx, :]
    wx_o = z[2 * cx:, :]

    f = jnp.maximum(tp, 0.0)                                             # ReLU

    # psi: 1-channel projection as VPU multiply + sublane reduce (no MXU)
    s = jax.nn.sigmoid(jnp.sum(f * wpsi, axis=0, keepdims=True) + bpsi)  # (1, N)

    # y = upsample(s, 64) * x  (nearest => same s for both phases); then the
    # W 1x1 conv commutes with the per-position scale: W(s*x)+bw = s*(W@x)+bw.
    wy_e = s * wx_e + bw
    wy_o = s * wx_o + bw

    # BatchNorm1d (training-mode batch stats over batch*length), two-pass
    # mean-shifted variance (biased, eps=1e-5).
    inv_cnt = 1.0 / (2 * n)
    mean = (jnp.sum(wy_e, axis=1, keepdims=True)
            + jnp.sum(wy_o, axis=1, keepdims=True)) * inv_cnt
    de = wy_e - mean
    do = wy_o - mean
    var = (jnp.sum(de * de, axis=1, keepdims=True)
           + jnp.sum(do * do, axis=1, keepdims=True)) * inv_cnt
    scale = gamma * jax.lax.rsqrt(var + EPS)

    # static lane-offset stores (no in-kernel lane concatenate)
    o_ref[:, :n] = de * scale + beta
    o_ref[:, n:] = do * scale + beta


def add_attn_pallas(x, g, params):
    """x: (B, Cx, 64) NCL float32 ; g: (B, Cg, Lg) NCL float32 -> (B, Cx, 64)."""
    B, Cx, Lx = x.shape
    _, Cg, Lg = g.shape
    assert Lx == 64
    L2 = Lx // 2  # 32
    # Lane-density: output lane width is 2*B*L2; keep it a multiple of 128
    # (B even) so stores are unmasked.  TODO(synk): pad/stack odd batches.
    assert (2 * B * L2) % 128 == 0, "batch must be even for lane-dense output"

    (Wt, Wphi, bphi, Wpsi, bpsi, Ww, bw, gamma, beta) = params

    # ---- layout plumbing (small XLA ops) ----
    # x -> pair-phase channel-major: rows [even-phase chans ; odd-phase chans],
    # cols (b, l) with l over the strided (k=2, s=2) positions.
    xp = jnp.transpose(x.reshape(B, Cx, L2, 2), (3, 1, 0, 2)).reshape(2 * Cx, B * L2)
    # g -> nearest upsample to L2 BEFORE phi; valid only because phi is a 1x1
    # pointwise conv (phi(upsample(g)) == upsample(phi(g))).
    idx32 = (jnp.arange(L2) * Lg) // L2
    g_up = jnp.transpose(g[:, :, idx32], (1, 0, 2)).reshape(Cg, B * L2)
    zin = jnp.concatenate([xp, g_up], axis=0)                  # (2Cx+Cg, B*32)

    # fused weight block (3Cx, 2Cx+Cg)
    zcx = jnp.zeros((Cx, Cx), jnp.float32)
    zcg = jnp.zeros((Cx, Cg), jnp.float32)
    wwm = Ww[:, :, 0]
    w_cat = jnp.concatenate([
        jnp.concatenate([Wt[:, :, 0], Wt[:, :, 1], Wphi[:, :, 0]], axis=1),
        jnp.concatenate([wwm, zcx, zcg], axis=1),
        jnp.concatenate([zcx, wwm, zcg], axis=1),
    ], axis=0)

    # packed per-channel params: columns [bphi, wpsi, bw, gamma, beta, bpsi]
    prm = jnp.stack([
        bphi,
        Wpsi[0, :, 0],
        bw,
        gamma,
        beta,
        jnp.full((Cx,), bpsi[0], jnp.float32),
    ], axis=1)                                                 # (Cx, 6)

    vmem = pl.BlockSpec(memory_space=pltpu.MemorySpace.VMEM)
    out_wide = pl.pallas_call(
        add_attn_kernel,
        out_shape=jax.ShapeDtypeStruct((Cx, 2 * B * L2), jnp.float32),
        in_specs=[vmem, vmem, vmem],
        out_specs=vmem,
        compiler_params=pltpu.CompilerParams(vmem_limit_bytes=2 * 1024 * 1024),
    )(zin, w_cat, prm)

    # epilogue: (Cx, [even|odd] x B x 32) -> (B, Cx, 64) NCL
    out = jnp.transpose(out_wide.reshape(Cx, 2, B, L2), (2, 0, 3, 1)).reshape(B, Cx, Lx)
    return out


def add_attn_reference(x, g, params):
    """Pure-jnp mirror of the PyTorch forward (NCL), for verification."""
    (Wt, Wphi, bphi, Wpsi, bpsi, Ww, bw, gamma, beta) = params
    B, Cx, Lx = x.shape
    _, Cg, Lg = g.shape
    theta_x = jnp.einsum('ock,bclk->bol', Wt, x.reshape(B, Cx, Lx // 2, 2))
    phi_g = jnp.einsum('oc,bcl->bol', Wphi[:, :, 0], g) + bphi[None, :, None]
    phi_up = phi_g[:, :, (jnp.arange(32) * Lg) // 32]
    f = jnp.maximum(theta_x + phi_up, 0.0)
    s = jax.nn.sigmoid(jnp.einsum('oc,bcl->bol', Wpsi[:, :, 0], f)
                       + bpsi[None, :, None])
    s_up = s[:, :, (jnp.arange(64) * 32) // 64]
    y = s_up * x
    wy = jnp.einsum('oc,bcl->bol', Ww[:, :, 0], y) + bw[None, :, None]
    mean = wy.mean(axis=(0, 2), keepdims=True)
    var = ((wy - mean) ** 2).mean(axis=(0, 2), keepdims=True)
    return gamma[None, :, None] * (wy - mean) / jnp.sqrt(var + EPS) \
        + beta[None, :, None]


if __name__ == "__main__":
    B, Cx, Cg, Lx, Lg = 2, 4, 8, 64, 16

    key = jax.random.PRNGKey(0)
    ks = jax.random.split(key, 12)
    x = jax.random.normal(ks[0], (B, Cx, Lx), jnp.float32)
    g = jax.random.normal(ks[1], (B, Cg, Lg), jnp.float32)

    # deterministic parameter init (PyTorch Conv1d weight layout: (Cout, Cin, K))
    Wt = 0.2 * jax.random.normal(ks[2], (Cx, Cx, 2), jnp.float32)     # theta
    Wphi = 0.2 * jax.random.normal(ks[3], (Cx, Cg, 1), jnp.float32)   # phi
    bphi = 0.1 * jax.random.normal(ks[4], (Cx,), jnp.float32)
    Wpsi = 0.2 * jax.random.normal(ks[5], (1, Cx, 1), jnp.float32)    # psi
    bpsi = 0.1 * jax.random.normal(ks[6], (1,), jnp.float32)
    Ww = 0.2 * jax.random.normal(ks[7], (Cx, Cx, 1), jnp.float32)     # W conv
    bw = 0.1 * jax.random.normal(ks[8], (Cx,), jnp.float32)
    gamma = 1.0 + 0.1 * jax.random.normal(ks[9], (Cx,), jnp.float32)  # BN weight
    beta = 0.1 * jax.random.normal(ks[10], (Cx,), jnp.float32)        # BN bias
    params = (Wt, Wphi, bphi, Wpsi, bpsi, Ww, bw, gamma, beta)

    out = add_attn_pallas(x, g, params)
    out = jax.block_until_ready(out)

    ref = add_attn_reference(x, g, params)
    assert out.shape == (B, Cx, Lx)
    assert jnp.allclose(out, ref, rtol=2e-3, atol=2e-3), \
        f"max abs err {jnp.max(jnp.abs(out - ref))}"

    print("KERNEL_OK")
</pallas_src>

<mosaic_0001>
module attributes {stable_mosaic.version = 11 : i64} {
  func.func @add_attn_kernel(%arg0: memref<16x64xf32, #tpu.memory_space<vmem>>, %arg1: memref<12x16xf32, #tpu.memory_space<vmem>>, %arg2: memref<4x6xf32, #tpu.memory_space<vmem>>, %arg3: memref<4x128xf32, #tpu.memory_space<vmem>>) attributes {dimension_semantics = [], scalar_prefetch = 0 : i64, scratch_operands = 0 : i64, tpu.core_type = #tpu.core_type<tc>} {
    %c0 = arith.constant 0 : index
    %c0_0 = arith.constant 0 : index
    %0 = vector.load %arg0[%c0, %c0_0] : memref<16x64xf32, #tpu.memory_space<vmem>>, vector<16x64xf32>
    %c0_1 = arith.constant 0 : index
    %c0_2 = arith.constant 0 : index
    %1 = vector.load %arg2[%c0_1, %c0_2] : memref<4x6xf32, #tpu.memory_space<vmem>>, vector<4x6xf32>
    %2 = vector.extract_strided_slice %1 {offsets = [0, 0], sizes = [4, 1], strides = [1, 1]} : vector<4x6xf32> to vector<4x1xf32>
    %3 = vector.extract_strided_slice %1 {offsets = [0, 1], sizes = [4, 1], strides = [1, 1]} : vector<4x6xf32> to vector<4x1xf32>
    %4 = vector.extract_strided_slice %1 {offsets = [0, 2], sizes = [4, 1], strides = [1, 1]} : vector<4x6xf32> to vector<4x1xf32>
    %5 = vector.extract_strided_slice %1 {offsets = [0, 3], sizes = [4, 1], strides = [1, 1]} : vector<4x6xf32> to vector<4x1xf32>
    %6 = vector.extract_strided_slice %1 {offsets = [0, 4], sizes = [4, 1], strides = [1, 1]} : vector<4x6xf32> to vector<4x1xf32>
    %7 = vector.extract_strided_slice %1 {offsets = [0, 5], sizes = [1, 1], strides = [1, 1]} : vector<4x6xf32> to vector<1x1xf32>
    %c0_3 = arith.constant 0 : index
    %c0_4 = arith.constant 0 : index
    %8 = vector.load %arg1[%c0_3, %c0_4] : memref<12x16xf32, #tpu.memory_space<vmem>>, vector<12x16xf32>
    %cst = arith.constant dense<0.000000e+00> : vector<12x64xf32>
    %9 = tpu.matmul %8, %0, %cst {dimension_numbers = #tpu.dot_dimension_numbers<[1], [0], [0], [1], [0, 0, 1, 1], [], []>} : vector<12x16xf32>, vector<16x64xf32>, vector<12x64xf32> -> vector<12x64xf32>
    %10 = vector.extract_strided_slice %9 {offsets = [0, 0], sizes = [4, 64], strides = [1, 1]} : vector<12x64xf32> to vector<4x64xf32>
    %11 = vector.broadcast %2 : vector<4x1xf32> to vector<4x64xf32>
    %12 = arith.addf %10, %11 : vector<4x64xf32>
    %13 = vector.extract_strided_slice %9 {offsets = [4, 0], sizes = [4, 64], strides = [1, 1]} : vector<12x64xf32> to vector<4x64xf32>
    %14 = vector.extract_strided_slice %9 {offsets = [8, 0], sizes = [4, 64], strides = [1, 1]} : vector<12x64xf32> to vector<4x64xf32>
    %cst_5 = arith.constant 0.000000e+00 : f32
    %15 = vector.broadcast %cst_5 : f32 to vector<4x64xf32>
    %16 = arith.maximumf %12, %15 : vector<4x64xf32>
    %17 = vector.broadcast %3 : vector<4x1xf32> to vector<4x64xf32>
    %18 = arith.mulf %16, %17 : vector<4x64xf32>
    %cst_6 = arith.constant dense<0.000000e+00> : vector<64xf32>
    %19 = vector.multi_reduction <add>, %18, %cst_6 [0] : vector<4x64xf32> to vector<64xf32>
    %20 = vector.shape_cast %19 : vector<64xf32> to vector<1x64xf32>
    %21 = vector.broadcast %7 : vector<1x1xf32> to vector<1x64xf32>
    %22 = arith.addf %20, %21 : vector<1x64xf32>
    %23 = arith.negf %22 : vector<1x64xf32>
    %24 = math.exp %23 : vector<1x64xf32>
    %cst_7 = arith.constant 1.000000e+00 : f32
    %25 = vector.broadcast %cst_7 : f32 to vector<1x64xf32>
    %26 = arith.addf %25, %24 : vector<1x64xf32>
    %27 = arith.divf %25, %26 : vector<1x64xf32>
    %28 = vector.broadcast %27 : vector<1x64xf32> to vector<4x64xf32>
    %29 = arith.mulf %28, %13 : vector<4x64xf32>
    %30 = vector.broadcast %4 : vector<4x1xf32> to vector<4x64xf32>
    %31 = arith.addf %29, %30 : vector<4x64xf32>
    %32 = vector.broadcast %27 : vector<1x64xf32> to vector<4x64xf32>
    %33 = arith.mulf %32, %14 : vector<4x64xf32>
    %34 = vector.broadcast %4 : vector<4x1xf32> to vector<4x64xf32>
    %35 = arith.addf %33, %34 : vector<4x64xf32>
    %cst_8 = arith.constant dense<0.000000e+00> : vector<4xf32>
    %36 = vector.multi_reduction <add>, %31, %cst_8 [1] : vector<4x64xf32> to vector<4xf32>
    %37 = vector.shape_cast %36 : vector<4xf32> to vector<4x1xf32>
    %cst_9 = arith.constant dense<0.000000e+00> : vector<4xf32>
    %38 = vector.multi_reduction <add>, %35, %cst_9 [1] : vector<4x64xf32> to vector<4xf32>
    %39 = vector.shape_cast %38 : vector<4xf32> to vector<4x1xf32>
    %40 = arith.addf %37, %39 : vector<4x1xf32>
    %cst_10 = arith.constant 7.812500e-03 : f32
    %41 = vector.broadcast %cst_10 : f32 to vector<4x1xf32>
    %42 = arith.mulf %40, %41 : vector<4x1xf32>
    %43 = vector.broadcast %42 : vector<4x1xf32> to vector<4x64xf32>
    %44 = arith.subf %31, %43 : vector<4x64xf32>
    %45 = vector.broadcast %42 : vector<4x1xf32> to vector<4x64xf32>
    %46 = arith.subf %35, %45 : vector<4x64xf32>
    %47 = arith.mulf %44, %44 : vector<4x64xf32>
    %cst_11 = arith.constant dense<0.000000e+00> : vector<4xf32>
    %48 = vector.multi_reduction <add>, %47, %cst_11 [1] : vector<4x64xf32> to vector<4xf32>
    %49 = vector.shape_cast %48 : vector<4xf32> to vector<4x1xf32>
    %50 = arith.mulf %46, %46 : vector<4x64xf32>
    %cst_12 = arith.constant dense<0.000000e+00> : vector<4xf32>
    %51 = vector.multi_reduction <add>, %50, %cst_12 [1] : vector<4x64xf32> to vector<4xf32>
    %52 = vector.shape_cast %51 : vector<4xf32> to vector<4x1xf32>
    %53 = arith.addf %49, %52 : vector<4x1xf32>
    %cst_13 = arith.constant 7.812500e-03 : f32
    %54 = vector.broadcast %cst_13 : f32 to vector<4x1xf32>
    %55 = arith.mulf %53, %54 : vector<4x1xf32>
    %cst_14 = arith.constant 9.99999974E-6 : f32
    %56 = vector.broadcast %cst_14 : f32 to vector<4x1xf32>
    %57 = arith.addf %55, %56 : vector<4x1xf32>
    %58 = math.rsqrt %57 : vector<4x1xf32>
    %59 = arith.mulf %5, %58 : vector<4x1xf32>
    %60 = vector.broadcast %59 : vector<4x1xf32> to vector<4x64xf32>
    %61 = arith.mulf %44, %60 : vector<4x64xf32>
    %62 = vector.broadcast %6 : vector<4x1xf32> to vector<4x64xf32>
    %63 = arith.addf %61, %62 : vector<4x64xf32>
    %c0_15 = arith.constant 0 : index
    %c0_16 = arith.constant 0 : index
    %64 = vector.load %arg3[%c0_15, %c0_16] : memref<4x128xf32, #tpu.memory_space<vmem>>, vector<4x64xf32>
    tpu.vector_store %arg3[%c0_15, %c0_16], %63 {strides = array<i32>} : memref<4x128xf32, #tpu.memory_space<vmem>>, vector<4x64xf32>,
    %65 = vector.broadcast %59 : vector<4x1xf32> to vector<4x64xf32>
    %66 = arith.mulf %46, %65 : vector<4x64xf32>
    %67 = vector.broadcast %6 : vector<4x1xf32> to vector<4x64xf32>
    %68 = arith.addf %66, %67 : vector<4x64xf32>
    %c0_17 = arith.constant 0 : index
    %c64 = arith.constant 64 : index
    %69 = vector.load %arg3[%c0_17, %c64] : memref<4x128xf32, #tpu.memory_space<vmem>>, vector<4x64xf32>
    tpu.vector_store %arg3[%c0_17, %c64], %68 {strides = array<i32>} : memref<4x128xf32, #tpu.memory_space<vmem>>, vector<4x64xf32>,
    return
  }
}

</mosaic_0001>

<bundles_post_ra>
// kernel: tpu_custom_call.1
= control target key start
LH: loop header
LB: loop body
LE: loop exit
PB: predicated region body
PF: predicated region fallthrough
CT: control target
= control target key end

     0   :  { %8 = vsyncpa [#allocation3], 0  ;;  %s462_s0 = inlined_call_operand.hbm [shape: f32[16,64], index: 0, kind: input, shape index: {}]   ;;  %s463_s1 = inlined_call_operand.hbm [shape: f32[12,16], index: 1, kind: input, shape index: {}]   ;;  %s464_s2 = inlined_call_operand.vmem [shape: f32[4,6], index: 2, kind: input, shape index: {}]   ;;  %s465_s3 = inlined_call_operand.hbm [shape: f32[4,128], index: 3, kind: output, shape index: {}]  }
   0x1   :  { %9 = vsyncpa [#allocation6], 0 }
   0x2   :  { %10 = vsyncpa [#allocation4], 0  ;;  %s374_s12 = smov [#allocation2]   ;;  %s302_s16 = scalar_lea.hbm %s462_s0, 256 }
   0x3   :  { %s16_s13 = sshll.u32 %s374_s12, 4  ;;  %p303_p0 = scmp.ne.s32.totalorder %s462_s0, %s302_s16  ;;  %s17_s13 = int_to_ptr.vmem [resolvable:$true] %s16_s13 }
   0x4   :  { %p306_p1 = scmp.lt.u32.totalorder %s302_s16, %s462_s0 }
   0x6   :  { %p308_p2 = pnand %p306_p1, %p303_p0 }
   0x8   :  { %311 = shalt.err (!%p308_p2)
}
   0x9   :  { %s312_s21 = scalar_lea.vmem %s17_s13, 256  ;;  %p317_p4 = scmp.lt.s32.totalorder %s17_s13, %s17_s13 }
   0xa   :  { %p313_p3 = scmp.ne.s32.totalorder %s17_s13, %s312_s21  ;;  %p318_p5 = scmp.lt.s32.totalorder %s312_s21, %s312_s21 }
   0xc   :  { %p319_p6 = por %p318_p5, %p317_p4 }
   0xe   :  { %p320_p7 = pnand %p319_p6, %p313_p3 }
  0x10   :  { %323 = shalt.err (!%p320_p7)
}
  0x11   :  { %s375_s22 = smov 128   ;;  %s376_s23 = smov 8  }
  0x12   :  { %22 = dma.hbm_to_vmem [thread:$0]  %s462_s0, 256, %s17_s13, [#allocation3], %s375_s22, %s375_s22, %s376_s23  }
  0x13   :  { %s377_s26 = smov [#allocation5]   ;;  %s324_s30 = scalar_lea.hbm %s463_s1, 256 }
  0x14   :  { %s28_s27 = sshll.u32 %s377_s26, 4  ;;  %p325_p8 = scmp.ne.s32.totalorder %s463_s1, %s324_s30  ;;  %s29_s27 = int_to_ptr.vmem [resolvable:$true] %s28_s27 }
  0x15   :  { %p328_p9 = scmp.lt.u32.totalorder %s324_s30, %s463_s1 }
  0x17   :  { %p330_p10 = pnand %p328_p9, %p325_p8 }
  0x19   :  { %333 = shalt.err (!%p330_p10)
}
  0x1a   :  { %s334_s8 = scalar_lea.vmem %s29_s27, 256  ;;  %p339_p12 = scmp.lt.s32.totalorder %s29_s27, %s29_s27 }
  0x1b   :  { %p335_p11 = scmp.ne.s32.totalorder %s29_s27, %s334_s8  ;;  %p340_p13 = scmp.lt.s32.totalorder %s334_s8, %s334_s8 }
  0x1d   :  { %p341_p0 = por %p340_p13, %p339_p12 }
  0x1f   :  { %p342_p1 = pnand %p341_p0, %p335_p11 }
  0x21   :  { %345 = shalt.err (!%p342_p1)
}
  0x22   :  { %34 = dma.hbm_to_vmem [thread:$0]  %s463_s1, 256, %s29_s27, [#allocation6], %s375_s22, %s375_s22, %s376_s23  }
  0x23   :  { %368 = dma.done.wait [#allocation3], 256  }
  0x24   :  { %369 = vsyncadd [#allocation3], 4294967040 }
  0x25   :  { %370 = dma.done.wait [#allocation6], 256  }
  0x26   :  { %371 = vsyncadd [#allocation6], 4294967040  ;;  %v378_v0 = vmov 0   ;;  %v379_v1 = vmov 5   ;;  %vm48_vm0 = vcmask 130048   ;;  %v43_v2 = vld [vmem:[#allocation2] sm:$0xff]  ;;  %v161_v29 = vlaneseq }
  0x27   :  { %288 = vset.pattern.permute.xlu0 %v378_v0  ;;  %290 = vset.pattern.permute.xlu1 %v379_v1  ;;  %v44_v3 = vld [vmem:[#allocation2 + $0x8] sm:$0xff]  ;;  %v46_v4 = vld [vmem:[#allocation5] sm:$0xff]  ;;  %v435_v6 = vld [vmem:[%s464_s2] sm:$0xf]  ;;  %v380_v8 = vmov 1   ;;  %v381_v9 = vmov 2  }
  0x28   :  { %v271_v5 = vpack.c.bf16 %v44_v3, %v43_v2  ;;  %268 = vmatprep.mubr.msk.f32.mxu0 %vm48_vm0, %v46_v4  ;;  %132 = vperm.xlu0 %288, %v435_v6   ;;  %v47_v7 = vld [vmem:[#allocation5 + $0x8] sm:$0xf]  ;;  %vm142_vm1 = vcmask 519168   ;;  %v162_v30 = vshrl.u32 %v161_v29, 7  ;;  %vm175_vm2 = vcmask 523268   ;;  %s384_s1 = smov 3  }
  0x29   :  { %151 = vperm.xlu1 %290, %v435_v6   ;;  %v382_v61 = vmov 3   ;;  %v383_v62 = vmov 4   ;;  %s385_s2 = smov 64   ;;  %s386_s12 = smov [#allocation7]   ;;  %vm239_vm3 = vcmask 1043968  }
  0x2a   :  { %272 = vmatprep.subr.bf16.mxu0 %v271_v5  ;;  %v163_v31 = vsub.s32 0, %v162_v30  ;;  %s247_s13 = sshll.u32 %s386_s12, 4  ;;  %s248_s13 = int_to_ptr.vmem [resolvable:$true] %s247_s13 }
  0x2b   :  { %274 = vmatpush3.bf16.msra.mxu0 %v271_v5  ;;  %s346_s14 = scalar_lea.vmem %s248_s13, 64  ;;  %p351_p3 = scmp.lt.s32.totalorder %s248_s13, %s248_s13 }
  0x2c   :  { %289 = vset.pattern.permute.xlu0 %v380_v8  ;;  %p347_p2 = scmp.ne.s32.totalorder %s248_s13, %s346_s14  ;;  %p352_p4 = scmp.lt.s32.totalorder %s346_s14, %s346_s14 }
  0x2d   :  { %291 = vset.pattern.permute.xlu1 %v381_v9  ;;  %138 = vperm.xlu0 %289, %v435_v6  }
  0x2e   :  { %269 = vmatmul.mubr.msk.f32.vlgmr.msra.gmra.mrb[0].mxu0 %vm48_vm0, %v47_v7  ;;  %167 = vperm.xlu1 %291, %v435_v6   ;;  %p353_p5 = por %p352_p4, %p351_p3 }
  0x30   :  { %p354_p6 = pnand %p353_p5, %p347_p2 }
  0x31   :  { %292 = vset.pattern.permute.xlu0 %v378_v0 }
  0x32   :  { %293 = vset.pattern.permute.xlu1 %v382_v61 }
  0xa7   :  { %v133_v10 = vpop.permute.xlu0 %132 }
  0xa8   :  { %v152_v23 = vpop.permute.xlu1 %151 }
  0xac   :  { %v139_v14 = vpop.permute.xlu0 %138 }
  0xad   :  { %v168_v32 = vpop.permute.xlu1 %167 }
  0xae   :  { %v170_v35 = vrot.slane %v168_v32, 4 }
 0x101   :  { %v270_v11 = vpop.f32.mrb[0].mxu0 }
 0x102   :  { %v121_v12 = vpop.f32.mrb[1].mxu0 }
 0x103   :  { %v135_v13 = vadd.f32 %v133_v10, %v121_v12 }
 0x105   :  { %v136_v15 = vmax.f32 %v135_v13, 0.0 }
 0x107   :  { %v141_v16 = vmul.f32 %v139_v14, %v136_v15 }
 0x109   :  { %v143_v17 = vsel %vm142_vm1, %v141_v16, 0.0 }
 0x10a   :  { %v144_v18 = vrot.slane %v143_v17, 4 }
 0x10c   :  { %v145_v19 = vadd.f32 %v144_v18, %v143_v17 }
 0x10e   :  { %v146_v20 = vrot.slane %v145_v19, 2 }
 0x110   :  { %v147_v21 = vadd.f32 %v146_v20, %v145_v19 }
 0x112   :  { %v148_v22 = vrot.slane %v147_v21, 1 }
 0x114   :  { %v149_v24 = vadd.f32 %v148_v22, %v147_v21 }
 0x116   :  { %v154_v25 = vadd.f32 %v152_v23, %v149_v24 }
 0x118   :  { %v259_v26 = vmul.f32 -1.442695, %v154_v25 }
 0x11a   :  { %296 = vpow2.f32 %v259_v26 }
 0x124   :  { %v297_v27 = vpop.eup %296 }
 0x125   :  { %v158_v28 = vadd.f32 1.0, %v297_v27 }
 0x127   :  { %298 = vrcp.f32 %v158_v28 }
 0x131   :  { %v299_v33 = vpop.eup %298 }
 0x132   :  { %v164_v34 = vrot.slane %v299_v33, %v163_v31 }
 0x134   :  { %v173_v36 = vmul.f32 %v270_v11, %v164_v34  ;;  %v165_v37 = vmul.f32 %v164_v34, %v121_v12 }
 0x136   :  { %v174_v38 = vadd.f32 %v173_v36, %v168_v32  ;;  %v172_v39 = vadd.f32 %v170_v35, %v165_v37 }
 0x138   :  { %v179_v40 = vsel %vm142_vm1, %v174_v38, 0.0  ;;  %v176_v41 = vsel %vm175_vm2, %v172_v39, 0.0 }
 0x139   :  { %180 = vadd.xlane.f32.xlu1 %v179_v40  ;;  %177 = vadd.xlane.f32.xlu0 %v176_v41 }
 0x1c6   :  { %v181_v42 = vpop.xlane.xlu1 %180  ;;  %v178_v44 = vpop.xlane.xlu0 %177 }
 0x1c7   :  { %v183_v43 = vrot.slane %v181_v42, 4 }
 0x1c9   :  { %v185_v45 = vadd.f32 %v183_v43, %v178_v44 }
 0x1cb   :  { %v186_v46 = vmul.f32 0.0078125, %v185_v45 }
 0x1cd   :  { %189 = vperm.xlu0 %292, %v186_v46  }
 0x1d1   :  { %295 = vset.pattern.permute.xlu0 %v383_v62 }
 0x24c   :  { %v190_v47 = vpop.permute.xlu0 %189 }
 0x24d   :  { %v193_v48 = vrot.slane %v190_v47, 4  ;;  %v192_v49 = vsub.f32 %v172_v39, %v190_v47 }
 0x24f   :  { %v195_v50 = vsub.f32 %v174_v38, %v193_v48  ;;  %v196_v53 = vmul.f32 %v192_v49, %v192_v49 }
 0x251   :  { %v200_v51 = vmul.f32 %v195_v50, %v195_v50  ;;  %v197_v54 = vsel %vm175_vm2, %v196_v53, 0.0 }
 0x253   :  { %v201_v52 = vsel %vm142_vm1, %v200_v51, 0.0 }
 0x254   :  { %202 = vadd.xlane.f32.xlu1 %v201_v52 }
 0x258   :  { %198 = vadd.xlane.f32.xlu1 %v197_v54 }
 0x2e1   :  { %v203_v55 = vpop.xlane.xlu1 %202 }
 0x2e2   :  { %v205_v56 = vrot.slane %v203_v55, 4 }
 0x2e5   :  { %v199_v57 = vpop.xlane.xlu1 %198 }
 0x2e6   :  { %v207_v58 = vadd.f32 %v205_v56, %v199_v57 }
 0x2e8   :  { %v208_v59 = vmul.f32 0.0078125, %v207_v58 }
 0x2ea   :  { %v209_v60 = vadd.f32 1e-05, %v208_v59 }
 0x2ec   :  { %300 = vrsqrt.f32 %v209_v60 }
 0x2f6   :  { %v301_v63 = vpop.eup %300 }
 0x2f7   :  { %v212_v0 = vrot.slane %v301_v63, 4 }
 0x2f9   :  { %213 = vrot.lane.b32.xlu1 %v212_v0, %s384_s1 }
 0x36b   :  { %v214_v1 = vpop.permute.xlu1 %213 }
 0x36c   :  { %v216_v2 = vmul.f32 %v214_v1, %v435_v6 }
 0x36e   :  { %219 = vperm.xlu1 %293, %v216_v2  }
 0x372   :  { %294 = vset.pattern.permute.xlu1 %v383_v62 }
 0x373   :  { %226 = vperm.xlu1 %294, %v435_v6  }
 0x3ed   :  { %v220_v3 = vpop.permute.xlu1 %219 }
 0x3ee   :  { %v222_v4 = vrot.slane %v220_v3, 4  ;;  %v233_v5 = vmul.f32 %v220_v3, %v195_v50 }
 0x3f0   :  { %v224_v8 = vmul.f32 %v222_v4, %v192_v49 }
 0x3f2   :  { %v227_v7 = vpop.permute.xlu1 %226 }
 0x3f3   :  { %v229_v9 = vrot.slane %v227_v7, 4  ;;  %v234_v10 = vadd.f32 %v233_v5, %v227_v7 }
 0x3f5   :  { %v231_v11 = vadd.f32 %v229_v9, %v224_v8  ;;  %236 = vrot.lane.b32.xlu1 %v234_v10, %s385_s2 }
 0x3f7   :  { %232 = vst.msk [vmem:[#allocation7 - $0x4] sm:$0xf0] %vm175_vm2, %v231_v11 }
 0x467   :  { %v237_v12 = vpop.permute.xlu1 %236 }
 0x468   :  { %240 = vst.msk [vmem:[#allocation7] sm:$0xf] %vm239_vm3, %v237_v12 }
 0x469   :  { %357 = shalt.err (!%p354_p6)
}
 0x46a   :  { %s358_s17 = scalar_lea.hbm %s465_s3, 64 }
 0x46b   :  { %p359_p7 = scmp.ne.s32.totalorder %s465_s3, %s358_s17  ;;  %p362_p8 = scmp.lt.u32.totalorder %s358_s17, %s465_s3 }
 0x46d   :  { %p364_p9 = pnand %p362_p8, %p359_p7 }
 0x46f   :  { %367 = shalt.err (!%p364_p9)
}
 0x470   :  { %250 = dma.vmem_to_hbm [thread:$0]  %s248_s13, 64, %s465_s3, [#allocation4]  }
 0x471   :  { %372 = dma.done.wait [#allocation4], 64  }
 0x472   :  { %373 = vsyncadd [#allocation4], 4294967232 }
 0x473   :  { %254 = vsyncpa [#allocation3], 1 }
 0x474   :  { %255 = vsyncpa [#allocation6], 1 }
 0x475   :  { %256 = vsyncpa [#allocation4], 1 }

</bundles_post_ra>
